<compile_context>
chip_gen: v5e
topology: v5e:2x2
jax: 0.10.0
libtpu: 0.0.40
codegen_flags: <defaults>
</compile_context>

<pallas_src>
import random
from itertools import combinations

import numpy as np

import jax
import jax.numpy as jnp
from jax.experimental import pallas as pl
from jax.experimental.pallas import tpu as pltpu


def _round_up(x, m):
    return ((x + m - 1) // m) * m


def _pick_tile(dim_pad):
    for t in (512, 256, 128):
        if dim_pad % t == 0:
            return t
    return dim_pad  # unreachable: dim_pad is always a multiple of 128


def _split_bf16(x_f32):
    """x = hi + lo with hi, lo bf16; hi+lo reconstructs x to ~2^-18 relative."""
    hi = x_f32.astype(jnp.bfloat16)
    lo = (x_f32 - hi.astype(jnp.float32)).astype(jnp.bfloat16)
    return hi, lo


# ----------------------------------------------------------------------------
# Kernel 1: pairwise distance matrix (pdist with eps=0), split-bf16 Gram form
# ----------------------------------------------------------------------------
def _pdist_kernel(ah_ref, al_ref, bh_ref, bl_ref, ra_ref, rb_ref, d_ref):
    k = pl.program_id(2)

    @pl.when(k == 0)
    def _():
        d_ref[...] = jnp.zeros_like(d_ref)

    # A @ B^T on the MXU, 3-pass bf16 hi/lo split, f32 accumulation directly
    # into the output tile (no scratch accumulator).
    dn = (((1,), (1,)), ((), ()))
    acc = jax.lax.dot_general(ah_ref[...], bh_ref[...], dn,
                              preferred_element_type=jnp.float32)
    acc += jax.lax.dot_general(ah_ref[...], bl_ref[...], dn,
                               preferred_element_type=jnp.float32)
    acc += jax.lax.dot_general(al_ref[...], bh_ref[...], dn,
                               preferred_element_type=jnp.float32)
    d_ref[...] += acc

    @pl.when(k == pl.num_programs(2) - 1)
    def _():
        d2 = ra_ref[...] + rb_ref[...] - 2.0 * d_ref[...]
        d_ref[...] = jnp.sqrt(jnp.maximum(d2, 0.0))


def pdist_pallas(x):
    """Full NxN Euclidean distance matrix (matches torch pdist(vectors, eps=0))."""
    x = jnp.asarray(x, jnp.float32)
    N, D = x.shape
    N_pad = _round_up(N, 128)
    D_pad = _round_up(D, 128)
    TM = TN = _pick_tile(N_pad)
    TK = _pick_tile(D_pad)

    xp = jnp.pad(x, ((0, N_pad - N), (0, D_pad - D)))
    x_hi, x_lo = _split_bf16(xp)
    sq = jnp.sum(xp * xp, axis=1, keepdims=True)   # (N_pad, 1) f32, exact rows
    sq_t = jnp.transpose(sq)                        # (1, N_pad)

    grid = (N_pad // TM, N_pad // TN, D_pad // TK)
    cost = pl.CostEstimate(
        flops=2 * 3 * N_pad * N_pad * D_pad,
        transcendentals=N_pad * N_pad,
        bytes_accessed=4 * N_pad * D_pad * 2 + N_pad * N_pad * 4,
    )

    # TODO(synk): exploit symmetry (upper-triangle tile grid + mirrored write)
    # for another ~2x on the Gram matmul.
    dist = pl.pallas_call(
        _pdist_kernel,
        out_shape=jax.ShapeDtypeStruct((N_pad, N_pad), jnp.float32),
        grid=grid,
        in_specs=[
            pl.BlockSpec((TM, TK), lambda i, j, k: (i, k)),
            pl.BlockSpec((TM, TK), lambda i, j, k: (i, k)),
            pl.BlockSpec((TN, TK), lambda i, j, k: (j, k)),
            pl.BlockSpec((TN, TK), lambda i, j, k: (j, k)),
            pl.BlockSpec((TM, 1), lambda i, j, k: (i, 0)),
            pl.BlockSpec((1, TN), lambda i, j, k: (0, j)),
        ],
        out_specs=pl.BlockSpec((TM, TN), lambda i, j, k: (i, j)),
        compiler_params=pltpu.CompilerParams(
            dimension_semantics=("parallel", "parallel", "arbitrary"),
            # Conservative request valid on every generation (v7x has only
            # 64 MiB physical VMEM); the 512x512x512 bf16 tiling uses ~7 MiB.
            vmem_limit_bytes=32 * 1024 * 1024,
        ),
        cost_estimate=cost,
    )(x_hi, x_lo, x_hi, x_lo, sq, sq_t)

    dist = dist[:N, :N]
    # Gram identity cancels catastrophically at d == 0; force exact zeros on
    # the diagonal (torch pairwise_distance with eps=0 gives exactly 0 there).
    return jnp.where(jnp.eye(N, dtype=bool), 0.0, dist)


# ----------------------------------------------------------------------------
# Kernel 2: batched triplet losses relu(||a-p+eps|| - ||a-n+eps|| + margin)
#           128 triplets per step, one-hot MXU gather against resident table
# ----------------------------------------------------------------------------
_TB = 128   # triplets per grid step -> one lane-dense (1, 128) loss row


def _make_triplet_block_kernel(margin, n_pad, tb):
    def kernel(ai_ref, pi_ref, ni_ref, eh_ref, el_ref, eps_ref, out_ref):
        ids = jax.lax.broadcasted_iota(jnp.int32, (n_pad, tb), 0)   # row ids
        oh_a = (ids == ai_ref[0]).astype(jnp.float32)               # (N_pad, TB)
        oh_p = (ids == pi_ref[0]).astype(jnp.float32)
        oh_n = (ids == ni_ref[0]).astype(jnp.float32)
        sel_ap = (oh_a - oh_p).astype(jnp.bfloat16)   # exactly {-1, 0, +1}
        sel_an = (oh_a - oh_n).astype(jnp.bfloat16)

        eh = eh_ref[...]   # (D_pad, N_pad) bf16 hi part, resident
        el = el_ref[...]   # (D_pad, N_pad) bf16 lo part, resident
        # (emb[a] - emb[p])^T gathered on the MXU, reconstructed to ~f32.
        d_ap = (jnp.dot(eh, sel_ap, preferred_element_type=jnp.float32)
                + jnp.dot(el, sel_ap, preferred_element_type=jnp.float32))
        d_an = (jnp.dot(eh, sel_an, preferred_element_type=jnp.float32)
                + jnp.dot(el, sel_an, preferred_element_type=jnp.float32))

        eps_col = eps_ref[...]        # (D_pad, 1): eps on real feature rows,
        dap = d_ap + eps_col          # 0 on padding rows (hoisted out of loop)
        dan = d_an + eps_col
        ap = jnp.sqrt(jnp.sum(dap * dap, axis=0, keepdims=True))   # (1, TB)
        an = jnp.sqrt(jnp.sum(dan * dan, axis=0, keepdims=True))   # (1, TB)
        out_ref[0] = jnp.maximum(ap - an + margin, 0.0)            # lane-dense

    return kernel


def triplet_losses_pallas(embeddings, anchors, positives, negatives, margin,
                          eps=1e-6):
    """Per-triplet losses, batched 128 per grid step; returns (T,) f32."""
    x = jnp.asarray(embeddings, jnp.float32)
    N, D = x.shape
    T = len(anchors)
    nb = max((T + _TB - 1) // _TB, 1)
    N_pad = _round_up(N, 128)
    D_pad = _round_up(D, 128)

    xp = jnp.pad(x, ((0, N_pad - N), (0, D_pad - D)))
    x_hi, x_lo = _split_bf16(xp)
    embT_hi = jnp.transpose(x_hi)     # (D_pad, N_pad), stays resident in VMEM
    embT_lo = jnp.transpose(x_lo)
    eps_col = (jnp.arange(D_pad) < D).astype(jnp.float32).reshape(D_pad, 1) * eps

    def pack_idx(idx):
        buf = np.zeros((nb * _TB,), dtype=np.int32)
        buf[:T] = np.asarray(idx, dtype=np.int32)
        return jnp.asarray(buf.reshape(nb, 1, _TB))

    a3, p3, n3 = pack_idx(anchors), pack_idx(positives), pack_idx(negatives)

    kernel = _make_triplet_block_kernel(float(margin), int(N_pad), _TB)
    idx_spec = pl.BlockSpec((1, 1, _TB), lambda b: (b, 0, 0))
    resident = lambda shape: pl.BlockSpec(shape, lambda b: (0, 0))

    # TODO(synk): for very large N*D the resident table should move to
    # memory_space=pl.ANY with a one-shot manual DMA instead of a VMEM block.
    losses = pl.pallas_call(
        kernel,
        out_shape=jax.ShapeDtypeStruct((nb, 1, _TB), jnp.float32),
        grid=(nb,),
        in_specs=[
            idx_spec, idx_spec, idx_spec,
            resident((D_pad, N_pad)),
            resident((D_pad, N_pad)),
            resident((D_pad, 1)),
        ],
        out_specs=pl.BlockSpec((1, 1, _TB), lambda b: (b, 0, 0)),
        compiler_params=pltpu.CompilerParams(
            dimension_semantics=("parallel",),   # both TensorCores on v7x
            vmem_limit_bytes=32 * 1024 * 1024,
        ),
    )(a3, p3, n3, embT_hi, embT_lo, eps_col)

    # Padded triplets are sliced away here (no in-kernel masking needed).
    return losses.reshape(-1)[:T]


# ----------------------------------------------------------------------------
# Host-side triplet selection (data-dependent python control flow)
# ----------------------------------------------------------------------------
# TODO(synk): the selection loop (dynamic-length lists, python random.choice
# for 'random_sh') has no clean Pallas equivalent; it runs on host in numpy.
def select_triplets(dist_mat, labels, margin, sampling_strategy="fixed_sh"):
    anchors, positives, negatives = [], [], []
    labels = np.asarray(labels)
    for label in np.unique(labels):
        label_mask = labels == label
        label_indices = np.where(label_mask)[0]
        if label_indices.shape[0] < 2:
            continue
        negative_indices = np.where(~label_mask)[0]
        if negative_indices.shape[0] == 0:
            continue
        for a_idx, p_idx in combinations(label_indices, 2):
            ap_dist = dist_mat[a_idx, p_idx]
            loss = ap_dist + margin - dist_mat[a_idx, negative_indices]
            possible = np.where(loss > 0)[0]
            if possible.shape[0] == 0:
                continue
            if sampling_strategy == "fixed_sh":
                neg_list_idx = int(np.argmax(loss))
            elif sampling_strategy == "random_sh":
                neg_list_idx = int(random.choice(list(possible)))
            else:
                continue
            anchors.append(int(a_idx))
            positives.append(int(p_idx))
            negatives.append(int(negative_indices[neg_list_idx]))
    return anchors, positives, negatives


# ----------------------------------------------------------------------------
# Full forward: OnlineTripleLoss(margin, strategy)(embeddings, labels)
# ----------------------------------------------------------------------------
def online_triplet_loss(embeddings, labels, margin, sampling_strategy="fixed_sh"):
    embeddings = jnp.asarray(embeddings, jnp.float32)

    # Hot path 1: pairwise distance matrix (Pallas, split-bf16 Gram + MXU).
    dist = pdist_pallas(embeddings)
    dist_np = np.asarray(jax.block_until_ready(dist))

    # Host glue: data-dependent semi-hard triplet selection.
    anchors, positives, negatives = select_triplets(
        dist_np, labels, margin, sampling_strategy)
    num_triplets = len(anchors)
    if num_triplets == 0:
        # torch returns NaN here (mean over an empty tensor).
        return jnp.float32(jnp.nan), 0, (anchors, positives, negatives)

    # Hot path 2: batched per-triplet losses (Pallas, one-hot MXU gather).
    losses = triplet_losses_pallas(embeddings, anchors, positives, negatives,
                                   margin)
    return jnp.mean(losses), num_triplets, (anchors, positives, negatives)


if __name__ == "__main__":
    key = jax.random.PRNGKey(0)
    N, D = 8, 32
    margin = 1.0

    embeddings = jax.random.normal(key, (N, D), dtype=jnp.float32)
    labels = np.array([0, 0, 1, 1, 2, 2, 0, 1], dtype=np.int32)

    # --- kernel 1 check: pdist vs numpy (tolerance matches split-bf16 MXU) ---
    dist = np.asarray(jax.block_until_ready(pdist_pallas(embeddings)))
    emb_np = np.asarray(embeddings).astype(np.float64)
    diff = emb_np[:, None, :] - emb_np[None, :, :]
    dist_ref = np.sqrt((diff ** 2).sum(-1))
    err = np.abs(dist - dist_ref).max()
    assert np.allclose(dist, dist_ref, atol=2e-3, rtol=2e-3), ("pdist err", err)

    # --- full forward ---
    loss_mean, num_triplets, triplets = online_triplet_loss(
        embeddings, labels, margin, sampling_strategy="fixed_sh")
    assert num_triplets >= 0

    # --- kernel 2 check: recompute loss on the selected triplets in numpy ---
    if num_triplets > 0:
        loss_mean_f = float(jax.block_until_ready(loss_mean))
        assert np.isfinite(loss_mean_f)
        a_i, p_i, n_i = (np.asarray(t, dtype=np.int64) for t in triplets)
        eps = 1e-6
        ap = np.sqrt((((emb_np[a_i] - emb_np[p_i]) + eps) ** 2).sum(-1))
        an = np.sqrt((((emb_np[a_i] - emb_np[n_i]) + eps) ** 2).sum(-1))
        loss_ref = float(np.maximum(ap - an + margin, 0.0).mean())
        assert abs(loss_mean_f - loss_ref) < 2e-3, (loss_mean_f, loss_ref)

    print("KERNEL_OK")
</pallas_src>

<mosaic_0001>
module attributes {stable_mosaic.version = 11 : i64} {
  func.func @_pdist_kernel(%arg0: i32, %arg1: i32, %arg2: i32, %arg3: memref<128x128xbf16, #tpu.memory_space<vmem>>, %arg4: memref<128x128xbf16, #tpu.memory_space<vmem>>, %arg5: memref<128x128xbf16, #tpu.memory_space<vmem>>, %arg6: memref<128x128xbf16, #tpu.memory_space<vmem>>, %arg7: memref<128x1xf32, #tpu.memory_space<vmem>>, %arg8: memref<1x128xf32, #tpu.memory_space<vmem>>, %arg9: memref<128x128xf32, #tpu.memory_space<vmem>>) attributes {dimension_semantics = [#tpu.dimension_semantics<parallel>, #tpu.dimension_semantics<parallel>, #tpu.dimension_semantics<arbitrary>], iteration_bounds = array<i64: 1, 1, 1>, scalar_prefetch = 0 : i64, scratch_operands = 0 : i64, tpu.core_type = #tpu.core_type<tc>, window_params = [{transform_indices = @transform_0, window_bounds = array<i64: 128, 128>}, {transform_indices = @transform_1, window_bounds = array<i64: 128, 128>}, {transform_indices = @transform_2, window_bounds = array<i64: 128, 128>}, {transform_indices = @transform_3, window_bounds = array<i64: 128, 128>}, {transform_indices = @transform_4, window_bounds = array<i64: 128, 1>}, {transform_indices = @transform_5, window_bounds = array<i64: 1, 128>}, {transform_indices = @transform_6, window_bounds = array<i64: 128, 128>}]} {
    %c0_i32 = arith.constant 0 : i32
    %0 = arith.cmpi eq, %arg2, %c0_i32 : i32
    %1 = arith.extui %0 : i1 to i32
    %c0_i32_0 = arith.constant 0 : i32
    %2 = arith.cmpi ne, %1, %c0_i32_0 : i32
    scf.if %2 {
      %cst_20 = arith.constant 0.000000e+00 : f32
      %20 = vector.broadcast %cst_20 : f32 to vector<128x128xf32>
      %c0_21 = arith.constant 0 : index
      %c0_22 = arith.constant 0 : index
      %21 = vector.load %arg9[%c0_21, %c0_22] : memref<128x128xf32, #tpu.memory_space<vmem>>, vector<128x128xf32>
      tpu.vector_store %arg9[%c0_21, %c0_22], %20 {strides = array<i32>} : memref<128x128xf32, #tpu.memory_space<vmem>>, vector<128x128xf32>,
    } else {
    }
    %c0 = arith.constant 0 : index
    %c0_1 = arith.constant 0 : index
    %3 = vector.load %arg3[%c0, %c0_1] : memref<128x128xbf16, #tpu.memory_space<vmem>>, vector<128x128xbf16>
    %c0_2 = arith.constant 0 : index
    %c0_3 = arith.constant 0 : index
    %4 = vector.load %arg5[%c0_2, %c0_3] : memref<128x128xbf16, #tpu.memory_space<vmem>>, vector<128x128xbf16>
    %cst = arith.constant dense<0.000000e+00> : vector<128x128xf32>
    %5 = tpu.matmul %3, %4, %cst {dimension_numbers = #tpu.dot_dimension_numbers<[1], [1], [0], [0], [0, 0, 1, 0], [], []>} : vector<128x128xbf16>, vector<128x128xbf16>, vector<128x128xf32> -> vector<128x128xf32>
    %c0_4 = arith.constant 0 : index
    %c0_5 = arith.constant 0 : index
    %6 = vector.load %arg3[%c0_4, %c0_5] : memref<128x128xbf16, #tpu.memory_space<vmem>>, vector<128x128xbf16>
    %c0_6 = arith.constant 0 : index
    %c0_7 = arith.constant 0 : index
    %7 = vector.load %arg6[%c0_6, %c0_7] : memref<128x128xbf16, #tpu.memory_space<vmem>>, vector<128x128xbf16>
    %cst_8 = arith.constant dense<0.000000e+00> : vector<128x128xf32>
    %8 = tpu.matmul %6, %7, %cst_8 {dimension_numbers = #tpu.dot_dimension_numbers<[1], [1], [0], [0], [0, 0, 1, 0], [], []>} : vector<128x128xbf16>, vector<128x128xbf16>, vector<128x128xf32> -> vector<128x128xf32>
    %9 = arith.addf %5, %8 : vector<128x128xf32>
    %c0_9 = arith.constant 0 : index
    %c0_10 = arith.constant 0 : index
    %10 = vector.load %arg4[%c0_9, %c0_10] : memref<128x128xbf16, #tpu.memory_space<vmem>>, vector<128x128xbf16>
    %c0_11 = arith.constant 0 : index
    %c0_12 = arith.constant 0 : index
    %11 = vector.load %arg5[%c0_11, %c0_12] : memref<128x128xbf16, #tpu.memory_space<vmem>>, vector<128x128xbf16>
    %cst_13 = arith.constant dense<0.000000e+00> : vector<128x128xf32>
    %12 = tpu.matmul %10, %11, %cst_13 {dimension_numbers = #tpu.dot_dimension_numbers<[1], [1], [0], [0], [0, 0, 1, 0], [], []>} : vector<128x128xbf16>, vector<128x128xbf16>, vector<128x128xf32> -> vector<128x128xf32>
    %13 = arith.addf %9, %12 : vector<128x128xf32>
    %c0_14 = arith.constant 0 : index
    %c0_15 = arith.constant 0 : index
    %14 = vector.load %arg9[%c0_14, %c0_15] : memref<128x128xf32, #tpu.memory_space<vmem>>, vector<128x128xf32>
    %15 = arith.addf %14, %13 : vector<128x128xf32>
    %c0_16 = arith.constant 0 : index
    %c0_17 = arith.constant 0 : index
    %16 = vector.load %arg9[%c0_16, %c0_17] : memref<128x128xf32, #tpu.memory_space<vmem>>, vector<128x128xf32>
    tpu.vector_store %arg9[%c0_16, %c0_17], %15 {strides = array<i32>} : memref<128x128xf32, #tpu.memory_space<vmem>>, vector<128x128xf32>,
    %c0_i32_18 = arith.constant 0 : i32
    %17 = arith.cmpi eq, %arg2, %c0_i32_18 : i32
    %18 = arith.extui %17 : i1 to i32
    %c0_i32_19 = arith.constant 0 : i32
    %19 = arith.cmpi ne, %18, %c0_i32_19 : i32
    scf.if %19 {
      %c0_20 = arith.constant 0 : index
      %c0_21 = arith.constant 0 : index
      %20 = vector.load %arg7[%c0_20, %c0_21] : memref<128x1xf32, #tpu.memory_space<vmem>>, vector<128x1xf32>
      %c0_22 = arith.constant 0 : index
      %c0_23 = arith.constant 0 : index
      %21 = vector.load %arg8[%c0_22, %c0_23] : memref<1x128xf32, #tpu.memory_space<vmem>>, vector<1x128xf32>
      %22 = vector.broadcast %20 : vector<128x1xf32> to vector<128x128xf32>
      %23 = vector.broadcast %21 : vector<1x128xf32> to vector<128x128xf32>
      %24 = arith.addf %22, %23 : vector<128x128xf32>
      %c0_24 = arith.constant 0 : index
      %c0_25 = arith.constant 0 : index
      %25 = vector.load %arg9[%c0_24, %c0_25] : memref<128x128xf32, #tpu.memory_space<vmem>>, vector<128x128xf32>
      %cst_26 = arith.constant 2.000000e+00 : f32
      %26 = vector.broadcast %cst_26 : f32 to vector<128x128xf32>
      %27 = arith.mulf %26, %25 : vector<128x128xf32>
      %28 = arith.subf %24, %27 : vector<128x128xf32>
      %cst_27 = arith.constant 0.000000e+00 : f32
      %29 = vector.broadcast %cst_27 : f32 to vector<128x128xf32>
      %30 = arith.maximumf %28, %29 : vector<128x128xf32>
      %31 = math.sqrt %30 : vector<128x128xf32>
      %c0_28 = arith.constant 0 : index
      %c0_29 = arith.constant 0 : index
      %32 = vector.load %arg9[%c0_28, %c0_29] : memref<128x128xf32, #tpu.memory_space<vmem>>, vector<128x128xf32>
      tpu.vector_store %arg9[%c0_28, %c0_29], %31 {strides = array<i32>} : memref<128x128xf32, #tpu.memory_space<vmem>>, vector<128x128xf32>,
    } else {
    }
    return
  }
  func.func @transform_0(%arg0: i32, %arg1: i32, %arg2: i32) -> (i32, i32) {
    %c0_i32 = arith.constant 0 : i32
    return %arg0, %arg2 : i32, i32
  }
  func.func @transform_1(%arg0: i32, %arg1: i32, %arg2: i32) -> (i32, i32) {
    %c0_i32 = arith.constant 0 : i32
    return %arg0, %arg2 : i32, i32
  }
  func.func @transform_2(%arg0: i32, %arg1: i32, %arg2: i32) -> (i32, i32) {
    %c0_i32 = arith.constant 0 : i32
    return %arg1, %arg2 : i32, i32
  }
  func.func @transform_3(%arg0: i32, %arg1: i32, %arg2: i32) -> (i32, i32) {
    %c0_i32 = arith.constant 0 : i32
    return %arg1, %arg2 : i32, i32
  }
  func.func @transform_4(%arg0: i32, %arg1: i32, %arg2: i32) -> (i32, i32) {
    %c0_i32 = arith.constant 0 : i32
    %c0_i32_0 = arith.constant 0 : i32
    return %arg0, %c0_i32 : i32, i32
  }
  func.func @transform_5(%arg0: i32, %arg1: i32, %arg2: i32) -> (i32, i32) {
    %c0_i32 = arith.constant 0 : i32
    %c0_i32_0 = arith.constant 0 : i32
    return %c0_i32, %arg1 : i32, i32
  }
  func.func @transform_6(%arg0: i32, %arg1: i32, %arg2: i32) -> (i32, i32) {
    %c0_i32 = arith.constant 0 : i32
    return %arg0, %arg1 : i32, i32
  }
}

</mosaic_0001>

<bundles_post_ra>
// kernel: tpu_custom_call.1
= control target key start
LH: loop header
LB: loop body
LE: loop exit
PB: predicated region body
PF: predicated region fallthrough
CT: control target
= control target key end

     0   :  { %11 = vsyncpa [#allocation3], 0  ;;  %s1524_s0 = inlined_call_operand.vmem [shape: bf16[128,128], index: 0, kind: input, shape index: {}]   ;;  %s1525_s1 = inlined_call_operand.vmem [shape: bf16[128,128], index: 1, kind: input, shape index: {}]   ;;  %s1526_s2 = inlined_call_operand.hbm [shape: bf16[128,128], index: 2, kind: input, shape index: {}]   ;;  %s1527_s3 = inlined_call_operand.hbm [shape: bf16[128,128], index: 3, kind: input, shape index: {}]   ;;  %s1528_s4 = inlined_call_operand.vmem [shape: f32[128,1], index: 4, kind: input, shape index: {}]   ;;  %s1529_s5 = inlined_call_operand.vmem [shape: f32[1,128], index: 5, kind: input, shape index: {}]   ;;  %s1530_s6 = inlined_call_operand.hbm [shape: f32[128,128], index: 6, kind: output, shape index: {}]  }
   0x1   :  { %12 = vsyncpa [#allocation6], 0 }
   0x2   :  { %13 = vsyncpa [#allocation4], 0  ;;  %s22_s23 = sshll.u32 %s1526_s2, 4  ;;  %s1253_s24 = smov [#allocation2]   ;;  %s23_s23 = int_to_ptr.hbm [resolvable:$true] %s22_s23 }
   0x3   :  { %s24_s25 = sshll.u32 %s1253_s24, 4  ;;  %s35_s28 = sshll.u32 %s1527_s3, 4  ;;  %s25_s25 = int_to_ptr.vmem [resolvable:$true] %s24_s25  ;;  %s36_s28 = int_to_ptr.hbm [resolvable:$true] %s35_s28 }
   0x4   :  { %s1254_s29 = smov 64   ;;  %s1255_s30 = smov 4  }
   0x5   :  { %30 = dma.hbm_to_vmem [thread:$0]  %s23_s23, 1024, %s25_s25, [#allocation3], %s1254_s29, %s1254_s29, %s1255_s30  }
   0x6   :  { %s1256_s7 = smov [#allocation5]  }
   0x7   :  { %s37_s8 = sshll.u32 %s1256_s7, 4  ;;  %s38_s8 = int_to_ptr.vmem [resolvable:$true] %s37_s8 }
   0x8   :  { %43 = dma.hbm_to_vmem [thread:$0]  %s36_s28, 1024, %s38_s8, [#allocation6], %s1254_s29, %s1254_s29, %s1255_s30  }
   0x9   :  { %1247 = dma.done.wait [#allocation3], 1024  }
   0xa   :  { %1248 = vsyncadd [#allocation3], 4294966272 }
   0xb   :  { %1249 = dma.done.wait [#allocation6], 1024  }
   0xc   :  { %1250 = vsyncadd [#allocation6], 4294966272  ;;  %v1097_v0 = vld [vmem:[#allocation2 + $0x38] sm:$0xff]  ;;  %v1096_v2 = vld [vmem:[#allocation2 + $0x30] sm:$0xff]  ;;  %v1257_v15 = vmov 0   ;;  %s940_s21 = sshll.u32 %s1530_s6, 4  ;;  %s941_s21 = int_to_ptr.hbm [resolvable:$true] %s940_s21 }
   0xd   :  { %v1105_v1 = vld [vmem:[#allocation5 + $0x38] sm:$0xff]  ;;  %317 = vmatpush.bf16.xpose.msra.mxu1 %v1097_v0  ;;  %430 = vmatpush.bf16.xpose.msra.mxu2 %v1097_v0  ;;  %v1104_v3 = vld [vmem:[#allocation5 + $0x30] sm:$0xff]  ;;  %v1095_v4 = vld [vmem:[#allocation2 + $0x28] sm:$0xff]  ;;  %s1259_s22 = smov 128   ;;  %s1260_s23 = smov 8  }
   0xe   :  { %220 = vmatpush.bf16.xpose.msra.mxu0 %v1105_v1  ;;  %1114 = vmatpush.bf16.xpose.msra.mxu3 %v1105_v1  ;;  %v1103_v5 = vld [vmem:[#allocation5 + $0x28] sm:$0xff]  ;;  %v1094_v6 = vld [vmem:[#allocation2 + $0x20] sm:$0xff]  ;;  %v1093_v8 = vld [vmem:[#allocation2 + $0x18] sm:$0xff] }
   0xf   :  { %v1102_v7 = vld [vmem:[#allocation5 + $0x20] sm:$0xff]  ;;  %v1101_v9 = vld [vmem:[#allocation5 + $0x18] sm:$0xff]  ;;  %v1092_v10 = vld [vmem:[#allocation2 + $0x10] sm:$0xff]  ;;  %1139 = vset.pattern.permute.xlu0 %v1257_v15  ;;  %1140 = vset.pattern.permute.xlu1 %v1257_v15 }
  0x10   :  { %v1100_v11 = vld [vmem:[#allocation5 + $0x10] sm:$0xff]  ;;  %v1091_v12 = vld [vmem:[#allocation2 + $0x8] sm:$0xff]  ;;  %v546_v14 = vld [vmem:[%s1528_s4] sm:$0xff]  ;;  %1141 = vset.pattern.permute.xlu2 %v1257_v15 }
  0x11   :  { %v1099_v13 = vld [vmem:[#allocation5 + $0x8] sm:$0xff]  ;;  %565 = vperm.xlu0 %1139, %v546_v14   ;;  %v1090_v16 = vld [vmem:[#allocation2] sm:$0xff]  ;;  %v548_v21 = vld [vmem:[%s1528_s4 + $0x10] sm:$0xff] }
  0x12   :  { %v1098_v17 = vld [vmem:[#allocation5] sm:$0xff]  ;;  %v547_v20 = vld [vmem:[%s1528_s4 + $0x8] sm:$0xff]  ;;  %575 = vperm.xlu1 %1140, %v548_v21   ;;  %v549_v24 = vld [vmem:[%s1528_s4 + $0x18] sm:$0xff] }
  0x13   :  { %v1082_v18 = vld [vmem:[%s1524_s0] sm:$0xff]  ;;  %v1083_v22 = vld [vmem:[%s1524_s0 + $0x8] sm:$0xff]  ;;  %v1088_v25 = vld [vmem:[%s1524_s0 + $0x30] sm:$0xff] }
  0x14   :  { %v1106_v19 = vld [vmem:[%s1525_s1] sm:$0xff]  ;;  %v1107_v23 = vld [vmem:[%s1525_s1 + $0x8] sm:$0xff]  ;;  %v1084_v26 = vld [vmem:[%s1524_s0 + $0x10] sm:$0xff] }
  0x15   :  { %318 = vmatpush.bf16.xpose.msra.mxu1 %v1096_v2  ;;  %431 = vmatpush.bf16.xpose.msra.mxu2 %v1096_v2  ;;  %v1108_v27 = vld [vmem:[%s1525_s1 + $0x10] sm:$0xff]  ;;  %v1089_v28 = vld [vmem:[%s1524_s0 + $0x38] sm:$0xff]  ;;  %v550_v32 = vld [vmem:[%s1528_s4 + $0x20] sm:$0xff] }
  0x16   :  { %221 = vmatpush.bf16.xpose.msra.mxu0 %v1104_v3  ;;  %1115 = vmatpush.bf16.xpose.msra.mxu3 %v1104_v3  ;;  %v552_v29 = vld [vmem:[%s1528_s4 + $0x30] sm:$0xff]  ;;  %v1085_v30 = vld [vmem:[%s1524_s0 + $0x18] sm:$0xff]  ;;  %v555_v34 = vld [vmem:[%s1528_s4 + $0x48] sm:$0xff] }
  0x17   :  { %v1109_v31 = vld [vmem:[%s1525_s1 + $0x18] sm:$0xff]  ;;  %585 = vperm.xlu2 %1141, %v550_v32   ;;  %v551_v35 = vld [vmem:[%s1528_s4 + $0x28] sm:$0xff]  ;;  %v1086_v36 = vld [vmem:[%s1524_s0 + $0x20] sm:$0xff] }
  0x18   :  { %v553_v33 = vld [vmem:[%s1528_s4 + $0x38] sm:$0xff]  ;;  %v1110_v37 = vld [vmem:[%s1525_s1 + $0x20] sm:$0xff]  ;;  %v556_v39 = vld [vmem:[%s1528_s4 + $0x50] sm:$0xff] }
  0x19   :  { %570 = vperm.xlu0 %1139, %v547_v20   ;;  %v558_v38 = vld [vmem:[%s1528_s4 + $0x60] sm:$0xff]  ;;  %v561_v40 = vld [vmem:[%s1528_s4 + $0x78] sm:$0xff]  ;;  %v1087_v41 = vld [vmem:[%s1524_s0 + $0x28] sm:$0xff] }
  0x1a   :  { %580 = vperm.xlu1 %1140, %v549_v24   ;;  %v1111_v42 = vld [vmem:[%s1525_s1 + $0x28] sm:$0xff]  ;;  %v554_v43 = vld [vmem:[%s1528_s4 + $0x40] sm:$0xff]  ;;  %v1112_v45 = vld [vmem:[%s1525_s1 + $0x30] sm:$0xff] }
  0x1b   :  { %v559_v44 = vld [vmem:[%s1528_s4 + $0x68] sm:$0xff]  ;;  %v557_v46 = vld [vmem:[%s1528_s4 + $0x58] sm:$0xff]  ;;  %v560_v47 = vld [vmem:[%s1528_s4 + $0x70] sm:$0xff] }
  0x1c   :  { %v1113_v48 = vld [vmem:[%s1525_s1 + $0x38] sm:$0xff]  ;;  %v1401_v53 = vld [vmem:[%s1529_s5] ss:$0 sm:$0xff]  ;;  %s1258_s1 = smov [#allocation7]  }
  0x1d   :  { %319 = vmatpush.bf16.xpose.msra.mxu1 %v1095_v4  ;;  %432 = vmatpush.bf16.xpose.msra.mxu2 %v1095_v4  ;;  %s938_s4 = sshll.u32 %s1258_s1, 4  ;;  %s939_s4 = int_to_ptr.vmem [resolvable:$true] %s938_s4 }
  0x1e   :  { %222 = vmatpush.bf16.xpose.msra.mxu0 %v1103_v5  ;;  %1116 = vmatpush.bf16.xpose.msra.mxu3 %v1103_v5 }
  0x1f   :  { %590 = vperm.xlu2 %1141, %v551_v35  }
  0x21   :  { %595 = vperm.xlu0 %1139, %v552_v29  }
  0x22   :  { %600 = vperm.xlu1 %1140, %v553_v33  }
  0x25   :  { %320 = vmatpush.bf16.xpose.msra.mxu1 %v1094_v6  ;;  %433 = vmatpush.bf16.xpose.msra.mxu2 %v1094_v6 }
  0x26   :  { %223 = vmatpush.bf16.xpose.msra.mxu0 %v1102_v7  ;;  %1117 = vmatpush.bf16.xpose.msra.mxu3 %v1102_v7 }
  0x27   :  { %605 = vperm.xlu2 %1141, %v554_v43  }
  0x29   :  { %610 = vperm.xlu0 %1139, %v555_v34  }
  0x2a   :  { %615 = vperm.xlu1 %1140, %v556_v39  }
  0x2d   :  { %321 = vmatpush.bf16.xpose.msra.mxu1 %v1093_v8  ;;  %434 = vmatpush.bf16.xpose.msra.mxu2 %v1093_v8 }
  0x2e   :  { %224 = vmatpush.bf16.xpose.msra.mxu0 %v1101_v9  ;;  %1118 = vmatpush.bf16.xpose.msra.mxu3 %v1101_v9 }
  0x2f   :  { %620 = vperm.xlu2 %1141, %v557_v46  }
  0x31   :  { %625 = vperm.xlu0 %1139, %v558_v38  }
  0x32   :  { %630 = vperm.xlu1 %1140, %v559_v44  }
  0x35   :  { %322 = vmatpush.bf16.xpose.msra.mxu1 %v1092_v10  ;;  %435 = vmatpush.bf16.xpose.msra.mxu2 %v1092_v10 }
  0x36   :  { %225 = vmatpush.bf16.xpose.msra.mxu0 %v1100_v11  ;;  %1119 = vmatpush.bf16.xpose.msra.mxu3 %v1100_v11 }
  0x37   :  { %635 = vperm.xlu2 %1141, %v560_v47  }
  0x39   :  { %640 = vperm.xlu0 %1139, %v561_v40  }
  0x3d   :  { %323 = vmatpush.bf16.xpose.msra.mxu1 %v1091_v12  ;;  %436 = vmatpush.bf16.xpose.msra.mxu2 %v1091_v12 }
  0x3e   :  { %226 = vmatpush.bf16.xpose.msra.mxu0 %v1099_v13  ;;  %1120 = vmatpush.bf16.xpose.msra.mxu3 %v1099_v13 }
  0x45   :  { %324 = vmatpush.bf16.xpose.msra.mxu1 %v1090_v16  ;;  %437 = vmatpush.bf16.xpose.msra.mxu2 %v1090_v16 }
  0x46   :  { %227 = vmatpush.bf16.xpose.msra.mxu0 %v1098_v17  ;;  %1121 = vmatpush.bf16.xpose.msra.mxu3 %v1098_v17 }
  0x4c   :  { %325 = vmatmul.bf16.vlgmr.msra.gmra.mxu1 %v1082_v18  ;;  %438 = vmatmul.bf16.vlgmr.msra.gmra.mxu2 %v1106_v19 }
  0x4d   :  { %228 = vmatmul.bf16.vlgmr.msra.gmra.mxu0 %v1082_v18  ;;  %258 = vmatmul.bf16.vlgmr.msra.gmra.mxu3 %v1088_v25 }
  0x4e   :  { %1122 = vmatpush.bf16.xpose.msrb.mxu3 %v1097_v0 }
  0x56   :  { %1123 = vmatpush.bf16.xpose.msrb.mxu3 %v1096_v2 }
  0x5c   :  { %330 = vmatmul.bf16.gmra.mxu1 %v1083_v22  ;;  %443 = vmatmul.bf16.gmra.mxu2 %v1107_v23 }
  0x5d   :  { %233 = vmatmul.bf16.gmra.mxu0 %v1083_v22  ;;  %263 = vmatmul.bf16.gmra.mxu3 %v1089_v28 }
  0x5e   :  { %1124 = vmatpush.bf16.xpose.msrb.mxu3 %v1095_v4 }
  0x66   :  { %1125 = vmatpush.bf16.xpose.msrb.mxu3 %v1094_v6 }
  0x6c   :  { %335 = vmatmul.bf16.gmra.mxu1 %v1084_v26  ;;  %448 = vmatmul.bf16.gmra.mxu2 %v1108_v27 }
  0x6d   :  { %238 = vmatmul.bf16.gmra.mxu0 %v1084_v26 }
  0x6e   :  { %1126 = vmatpush.bf16.xpose.msrb.mxu3 %v1093_v8 }
  0x71   :  { %v586_v40 = vpop.permute.xlu2 %585 }
  0x76   :  { %1127 = vmatpush.bf16.xpose.msrb.mxu3 %v1092_v10 }
  0x7c   :  { %340 = vmatmul.bf16.gmra.mxu1 %v1085_v30  ;;  %453 = vmatmul.bf16.gmra.mxu2 %v1109_v31 }
  0x7d   :  { %243 = vmatmul.bf16.gmra.mxu0 %v1085_v30 }
  0x7e   :  { %1128 = vmatpush.bf16.xpose.msrb.mxu3 %v1091_v12 }
  0x83   :  { %v566_v52 = vpop.permute.xlu0 %565 }
  0x84   :  { %v646_v58 = vadd.f32 %v1401_v53, %v566_v52  ;;  %v576_v7 = vpop.permute.xlu1 %575  ;;  %v650_v52 = vadd.f32 %v1401_v53, %v586_v40 }
  0x86   :  { %1129 = vmatpush.bf16.xpose.msrb.mxu3 %v1090_v16  ;;  %v648_v16 = vadd.f32 %v1401_v53, %v576_v7 }
  0x8b   :  { %v571_v63 = vpop.permute.xlu0 %570 }
  0x8c   :  { %345 = vmatmul.bf16.gmra.mxu1 %v1086_v36  ;;  %458 = vmatmul.bf16.gmra.mxu2 %v1110_v37  ;;  %v647_v4 = vadd.f32 %v1401_v53, %v571_v63  ;;  %v581_v24 = vpop.permute.xlu1 %580 }
  0x8d   :  { %360 = vmatmul.bf16.vlgmr.msrb.gmra.mxu3 %v1089_v28  ;;  %248 = vmatmul.bf16.gmra.mxu0 %v1086_v36  ;;  %v649_v32 = vadd.f32 %v1401_v53, %v581_v24 }
  0x9c   :  { %350 = vmatmul.bf16.gmra.mxu1 %v1087_v41  ;;  %463 = vmatmul.bf16.gmra.mxu2 %v1111_v42 }
  0x9d   :  { %253 = vmatmul.bf16.gmra.mxu0 %v1087_v41 }
  0xac   :  { %355 = vmatmul.bf16.gmra.mxu1 %v1088_v25  ;;  %468 = vmatmul.bf16.gmra.mxu2 %v1112_v45 }
  0xbc   :  { %473 = vmatmul.bf16.gmra.mxu2 %v1113_v48 }
  0xc9   :  { %v326_v49 = vpop.f32.mrf.mxu1 }
  0xca   :  { %v229_v50 = vpop.f32.mrf.mxu0 }
  0xcb   :  { %v327_v51 = vadd.f32 %v326_v49, %v229_v50 }
  0xcf   :  { %v439_v54 = vpop.f32.mrf.mxu2 }
  0xd0   :  { %v479_v55 = vadd.f32 %v439_v54, %v327_v51 }
  0xd1   :  { %v328_v56 = vpop.f32.mrf.mxu1 }
  0xd2   :  { %v231_v57 = vpop.f32.mrf.mxu0  ;;  %v678_v60 = vmul.f32 2.0, %v479_v55 }
  0xd3   :  { %v329_v59 = vadd.f32 %v328_v56, %v231_v57 }
  0xd4   :  { %v694_v61 = vsub.f32 %v646_v58, %v678_v60 }
  0xd6   :  { %v710_v1 = vmax.f32 %v694_v61, 0.0 }
  0xd7   :  { %v441_v62 = vpop.f32.mrf.mxu2 }
  0xd8   :  { %v480_v0 = vadd.f32 %v441_v62, %v329_v59  ;;  %1143 = vrsqrt.f32 %v710_v1  ;;  %vm733_vm0 = vcmp.eq.f32.partialorder %v710_v1, inf  ;;  %v736_v35 = vand.u32 2147483648, %v710_v1 }
  0xd9   :  { %v331_v2 = vpop.f32.mrf.mxu1  ;;  %vm735_vm1 = vcmp.eq.f32.partialorder %v710_v1, 0.0 }
  0xda   :  { %v234_v3 = vpop.f32.mrf.mxu0  ;;  %v679_v6 = vmul.f32 2.0, %v480_v0 }
  0xdb   :  { %v332_v5 = vadd.f32 %v331_v2, %v234_v3 }
  0xdc   :  { %v695_v8 = vsub.f32 %v647_v4, %v679_v6 }
  0xde   :  { %v1144_v10 = vpop.eup %1143  ;;  %v711_v12 = vmax.f32 %v695_v8, 0.0 }
  0xdf   :  { %v444_v9 = vpop.f32.mrf.mxu2  ;;  %v727_v13 = vmul.f32 %v1144_v10, %v710_v1 }
  0xe0   :  { %v481_v11 = vadd.f32 %v444_v9, %v332_v5  ;;  %1145 = vrsqrt.f32 %v711_v12  ;;  %vm745_vm2 = vcmp.eq.f32.partialorder %v711_v12, inf  ;;  %v748_v56 = vand.u32 2147483648, %v711_v12 }
  0xe1   :  { %v333_v14 = vpop.f32.mrf.mxu1  ;;  %v728_v17 = vmul.f32 %v1144_v10, %v727_v13  ;;  %vm747_vm3 = vcmp.eq.f32.partialorder %v711_v12, 0.0 }
  0xe2   :  { %v236_v15 = vpop.f32.mrf.mxu0  ;;  %v680_v19 = vmul.f32 2.0, %v481_v11 }
  0xe3   :  { %v334_v18 = vadd.f32 %v333_v14, %v236_v15  ;;  %v729_v20 = vmul.f32 0.5, %v728_v17 }
  0xe4   :  { %v696_v21 = vsub.f32 %v648_v16, %v680_v19 }
  0xe5   :  { %v730_v22 = vsub.f32 1.5, %v729_v20 }
  0xe6   :  { %v1146_v25 = vpop.eup %1145  ;;  %v1406_v27 = vmax.f32 %v696_v21, 0.0  ;;  %v596_v21 = vpop.permute.xlu0 %595 }
  0xe7   :  { %v446_v23 = vpop.f32.mrf.mxu2  ;;  %v731_v28 = vmul.f32 %v1144_v10, %v730_v22  ;;  %v739_v29 = vmul.f32 %v1146_v25, %v711_v12 }
  0xe8   :  { %v482_v26 = vadd.f32 %v446_v23, %v334_v18  ;;  %1147 = vrsqrt.f32 %v1406_v27  ;;  %vm757_vm4 = vcmp.eq.f32.partialorder %v1406_v27, inf  ;;  %vm759_vm5 = vcmp.eq.f32.partialorder %v1406_v27, 0.0 }
  0xe9   :  { %v336_v30 = vpop.f32.mrf.mxu1  ;;  %v732_v33 = vmul.f32 %v731_v28, %v710_v1  ;;  %v740_v34 = vmul.f32 %v1146_v25, %v739_v29 }
  0xea   :  { %v239_v31 = vpop.f32.mrf.mxu0  ;;  %v681_v37 = vmul.f32 2.0, %v482_v26 }
  0xeb   :  { %v337_v36 = vadd.f32 %v336_v30, %v239_v31  ;;  %v734_v38 = vsel %vm733_vm0, %v710_v1, %v732_v33  ;;  %v741_v39 = vmul.f32 0.5, %v740_v34  ;;  %v591_v1 = vpop.permute.xlu2 %590 }
  0xec   :  { %v737_v41 = vsel %vm735_vm1, %v736_v35, %v734_v38  ;;  %v697_v42 = vsub.f32 %v649_v32, %v681_v37  ;;  %v651_v9 = vadd.f32 %v1401_v53, %v591_v1 }
  0xed   :  { %918 = vst [vmem:[#allocation7] sm:$0xff] %v737_v41  ;;  %v742_v43 = vsub.f32 1.5, %v741_v39  ;;  %v601_v41 = vpop.permute.xlu1 %600 }
  0xee   :  { %v1148_v45 = vpop.eup %1147  ;;  %v1410_v47 = vmax.f32 %v697_v42, 0.0 }
  0xef   :  { %v449_v44 = vpop.f32.mrf.mxu2  ;;  %v743_v48 = vmul.f32 %v1146_v25, %v742_v43  ;;  %v751_v49 = vmul.f32 %v1148_v45, %v1406_v27 }
  0xf0   :  { %v483_v46 = vadd.f32 %v449_v44, %v337_v36  ;;  %1149 = vrsqrt.f32 %v1410_v47  ;;  %vm769_vm6 = vcmp.eq.f32.partialorder %v1410_v47, inf  ;;  %v772_v32 = vand.u32 2147483648, %v1410_v47 }
  0xf1   :  { %v338_v50 = vpop.f32.mrf.mxu1  ;;  %v744_v54 = vmul.f32 %v743_v48, %v711_v12  ;;  %v752_v55 = vmul.f32 %v1148_v45, %v751_v49  ;;  %vm771_vm7 = vcmp.eq.f32.partialorder %v1410_v47, 0.0 }
  0xf2   :  { %v241_v51 = vpop.f32.mrf.mxu0  ;;  %v682_v58 = vmul.f32 2.0, %v483_v46 }
  0xf3   :  { %v339_v57 = vadd.f32 %v338_v50, %v241_v51  ;;  %v746_v59 = vsel %vm745_vm2, %v711_v12, %v744_v54  ;;  %v753_v60 = vmul.f32 0.5, %v752_v55  ;;  %v760_v12 = vand.u32 2147483648, %v1406_v27 }
  0xf4   :  { %v749_v61 = vsel %vm747_vm3, %v748_v56, %v746_v59  ;;  %v698_v62 = vsub.f32 %v650_v52, %v682_v58 }
  0xf5   :  { %919 = vst [vmem:[#allocation7 + $0x8] sm:$0xff] %v749_v61  ;;  %v754_v63 = vsub.f32 1.5, %v753_v60 }
  0xf6   :  { %v1150_v2 = vpop.eup %1149  ;;  %v1415_v4 = vmax.f32 %v698_v62, 0.0  ;;  %v606_v62 = vpop.permute.xlu2 %605 }
  0xf7   :  { %v451_v0 = vpop.f32.mrf.mxu2  ;;  %v755_v5 = vmul.f32 %v1148_v45, %v754_v63  ;;  %v763_v6 = vmul.f32 %v1150_v2, %v1410_v47 }
  0xf8   :  { %v484_v3 = vadd.f32 %v451_v0, %v339_v57  ;;  %1151 = vrsqrt.f32 %v1415_v4  ;;  %vm781_vm8 = vcmp.eq.f32.partialorder %v1415_v4, inf  ;;  %v784_v52 = vand.u32 2147483648, %v1415_v4 }
  0xf9   :  { %v341_v7 = vpop.f32.mrf.mxu1  ;;  %v756_v10 = vmul.f32 %v755_v5, %v1406_v27  ;;  %v764_v11 = vmul.f32 %v1150_v2, %v763_v6  ;;  %vm783_vm9 = vcmp.eq.f32.partialorder %v1415_v4, 0.0 }
  0xfa   :  { %v244_v8 = vpop.f32.mrf.mxu0  ;;  %v683_v14 = vmul.f32 2.0, %v484_v3  ;;  %v1447_v3 = vpop.f32.mrf.mxu3 }
  0xfb   :  { %v342_v13 = vadd.f32 %v341_v7, %v244_v8  ;;  %v758_v15 = vsel %vm757_vm4, %v1406_v27, %v756_v10  ;;  %v765_v16 = vmul.f32 0.5, %v764_v11  ;;  %v652_v27 = vadd.f32 %v1401_v53, %v596_v21 }
  0xfc   :  { %v761_v17 = vsel %vm759_vm5, %v760_v12, %v758_v15  ;;  %v699_v18 = vsub.f32 %v651_v9, %v683_v14  ;;  %v654_v7 = vadd.f32 %v1401_v53, %v606_v62 }
  0xfd   :  { %920 = vst [vmem:[#allocation7 + $0x10] sm:$0xff] %v761_v17  ;;  %v766_v19 = vsub.f32 1.5, %v765_v16 }
  0xfe   :  { %v1152_v22 = vpop.eup %1151  ;;  %v1425_v24 = vmax.f32 %v699_v18, 0.0 }
  0xff   :  { %v454_v20 = vpop.f32.mrf.mxu2  ;;  %v767_v25 = vmul.f32 %v1150_v2, %v766_v19  ;;  %v775_v26 = vmul.f32 %v1152_v22, %v1415_v4 }
 0x100   :  { %v485_v23 = vadd.f32 %v454_v20, %v342_v13  ;;  %1153 = vrsqrt.f32 %v1425_v24  ;;  %vm793_vm10 = vcmp.eq.f32.partialorder %v1425_v24, inf  ;;  %v796_v10 = vand.u32 2147483648, %v1425_v24 }
 0x101   :  { %v343_v28 = vpop.f32.mrf.mxu1  ;;  %v768_v30 = vmul.f32 %v767_v25, %v1410_v47  ;;  %v776_v31 = vmul.f32 %v1152_v22, %v775_v26  ;;  %vm795_vm11 = vcmp.eq.f32.partialorder %v1425_v24, 0.0  ;;  %v611_v26 = vpop.permute.xlu0 %610 }
 0x102   :  { %v246_v29 = vpop.f32.mrf.mxu0  ;;  %v684_v34 = vmul.f32 2.0, %v485_v23 }
 0x103   :  { %v344_v33 = vadd.f32 %v343_v28, %v246_v29  ;;  %v770_v35 = vsel %vm769_vm6, %v1410_v47, %v768_v30  ;;  %v777_v36 = vmul.f32 0.5, %v776_v31  ;;  %v653_v47 = vadd.f32 %v1401_v53, %v601_v41 }
 0x104   :  { %v773_v37 = vsel %vm771_vm7, %v772_v32, %v770_v35  ;;  %v700_v38 = vsub.f32 %v652_v27, %v684_v34  ;;  %v655_v28 = vadd.f32 %v1401_v53, %v611_v26  ;;  %v1463_v27 = vpop.f32.mrf.mxu3 }
 0x105   :  { %921 = vst [vmem:[#allocation7 + $0x18] sm:$0xff] %v773_v37  ;;  %v778_v39 = vsub.f32 1.5, %v777_v36 }
 0x106   :  { %v1154_v42 = vpop.eup %1153  ;;  %v1435_v44 = vmax.f32 %v700_v38, 0.0 }
 0x107   :  { %v456_v40 = vpop.f32.mrf.mxu2  ;;  %v779_v45 = vmul.f32 %v1152_v22, %v778_v39  ;;  %v787_v46 = vmul.f32 %v1154_v42, %v1425_v24 }
 0x108   :  { %v486_v43 = vadd.f32 %v456_v40, %v344_v33  ;;  %1155 = vrsqrt.f32 %v1435_v44  ;;  %vm805_vm12 = vcmp.eq.f32.partialorder %v1435_v44, inf  ;;  %v808_v31 = vand.u32 2147483648, %v1435_v44 }
 0x109   :  { %v346_v48 = vpop.f32.mrf.mxu1  ;;  %v780_v50 = vmul.f32 %v779_v45, %v1415_v4  ;;  %v788_v51 = vmul.f32 %v1154_v42, %v787_v46  ;;  %vm807_vm13 = vcmp.eq.f32.partialorder %v1435_v44, 0.0 }
 0x10a   :  { %v249_v49 = vpop.f32.mrf.mxu0  ;;  %v685_v55 = vmul.f32 2.0, %v486_v43  ;;  %v616_v43 = vpop.permute.xlu1 %615 }
 0x10b   :  { %v347_v54 = vadd.f32 %v346_v48, %v249_v49  ;;  %v782_v56 = vsel %vm781_vm8, %v1415_v4, %v780_v50  ;;  %v789_v57 = vmul.f32 0.5, %v788_v51  ;;  %v656_v50 = vadd.f32 %v1401_v53, %v616_v43 }
 0x10c   :  { %v785_v58 = vsel %vm783_vm9, %v784_v52, %v782_v56  ;;  %v701_v59 = vsub.f32 %v653_v47, %v685_v55  ;;  %v1479_v55 = vpop.f32.mrf.mxu3 }
 0x10d   :  { %922 = vst [vmem:[#allocation7 + $0x20] sm:$0xff] %v785_v58  ;;  %v790_v60 = vsub.f32 1.5, %v789_v57 }
 0x10e   :  { %v1156_v63 = vpop.eup %1155  ;;  %v1445_v1 = vmax.f32 %v701_v59, 0.0 }
 0x10f   :  { %v459_v61 = vpop.f32.mrf.mxu2  ;;  %v791_v2 = vmul.f32 %v1154_v42, %v790_v60  ;;  %v799_v5 = vmul.f32 %v1156_v63, %v1435_v44 }
 0x110   :  { %v487_v0 = vadd.f32 %v459_v61, %v347_v54  ;;  %1157 = vrsqrt.f32 %v1445_v1  ;;  %vm817_vm14 = vcmp.eq.f32.partialorder %v1445_v1, inf  ;;  %v820_v51 = vand.u32 2147483648, %v1445_v1 }
 0x111   :  { %v348_v6 = vpop.f32.mrf.mxu1  ;;  %v792_v8 = vmul.f32 %v791_v2, %v1425_v24  ;;  %v800_v9 = vmul.f32 %v1156_v63, %v799_v5  ;;  %vm819_vm15 = vcmp.eq.f32.partialorder %v1445_v1, 0.0 }
 0x112   :  { %v251_v4 = vpop.f32.mrf.mxu0  ;;  %v686_v12 = vmul.f32 2.0, %v487_v0 }
 0x113   :  { %v349_v11 = vadd.f32 %v348_v6, %v251_v4  ;;  %v794_v13 = vsel %vm793_vm10, %v1425_v24, %v792_v8  ;;  %v801_v14 = vmul.f32 0.5, %v800_v9  ;;  %v621_v6 = vpop.permute.xlu2 %620 }
 0x114   :  { %v797_v15 = vsel %vm795_vm11, %v796_v10, %v794_v13  ;;  %v702_v16 = vsub.f32 %v654_v7, %v686_v12 }
 0x115   :  { %923 = vst [vmem:[#allocation7 + $0x28] sm:$0xff] %v797_v15  ;;  %v802_v17 = vsub.f32 1.5, %v801_v14 }
 0x116   :  { %v1158_v19 = vpop.eup %1157  ;;  %v1457_v21 = vmax.f32 %v702_v16, 0.0 }
 0x117   :  { %v461_v18 = vpop.f32.mrf.mxu2  ;;  %v803_v22 = vmul.f32 %v1156_v63, %v802_v17  ;;  %v811_v23 = vmul.f32 %v1158_v19, %v1445_v1  ;;  %v1492_v17 = vpop.f32.mrf.mxu3 }
 0x118   :  { %v488_v20 = vadd.f32 %v461_v18, %v349_v11  ;;  %1159 = vrsqrt.f32 %v1457_v21  ;;  %vm829_vm0 = vcmp.eq.f32.partialorder %v1457_v21, inf  ;;  %v832_v9 = vand.u32 2147483648, %v1457_v21 }
 0x119   :  { %v351_v25 = vpop.f32.mrf.mxu1  ;;  %v804_v29 = vmul.f32 %v803_v22, %v1435_v44  ;;  %v812_v30 = vmul.f32 %v1158_v19, %v811_v23  ;;  %vm831_vm1 = vcmp.eq.f32.partialorder %v1457_v21, 0.0 }
 0x11a   :  { %v254_v24 = vpop.f32.mrf.mxu0  ;;  %v687_v32 = vmul.f32 2.0, %v488_v20 }
 0x11b   :  { %v352_v33 = vadd.f32 %v351_v25, %v254_v24  ;;  %v806_v34 = vsel %vm805_vm12, %v1435_v44, %v804_v29  ;;  %v813_v35 = vmul.f32 0.5, %v812_v30 }
 0x11c   :  { %v809_v36 = vsel %vm807_vm13, %v808_v31, %v806_v34  ;;  %v703_v37 = vsub.f32 %v655_v28, %v687_v32 }
 0x11d   :  { %924 = vst [vmem:[#allocation7 + $0x30] sm:$0xff] %v809_v36  ;;  %v814_v38 = vsub.f32 1.5, %v813_v35 }
 0x11e   :  { %v1160_v40 = vpop.eup %1159  ;;  %v1469_v41 = vmax.f32 %v703_v37, 0.0 }
 0x11f   :  { %v464_v39 = vpop.f32.mrf.mxu2  ;;  %v815_v45 = vmul.f32 %v1158_v19, %v814_v38  ;;  %v823_v46 = vmul.f32 %v1160_v40, %v1457_v21 }
 0x120   :  { %v489_v42 = vadd.f32 %v464_v39, %v352_v33  ;;  %1161 = vrsqrt.f32 %v1469_v41  ;;  %vm841_vm2 = vcmp.eq.f32.partialorder %v1469_v41, inf  ;;  %vm843_vm3 = vcmp.eq.f32.partialorder %v1469_v41, 0.0  ;;  %v361_v39 = vpop.f32.mrf.mxu3 }
 0x121   :  { %v353_v48 = vpop.f32.mrf.mxu1  ;;  %v816_v44 = vmul.f32 %v815_v45, %v1445_v1  ;;  %v824_v47 = vmul.f32 %v1160_v40, %v823_v46  ;;  %v631_v45 = vpop.permute.xlu1 %630 }
 0x122   :  { %v256_v49 = vpop.f32.mrf.mxu0  ;;  %v688_v57 = vmul.f32 2.0, %v489_v42 }
 0x123   :  { %v354_v52 = vadd.f32 %v353_v48, %v256_v49  ;;  %v818_v54 = vsel %vm817_vm14, %v1445_v1, %v816_v44  ;;  %v825_v56 = vmul.f32 0.5, %v824_v47  ;;  %v657_v1 = vadd.f32 %v1401_v53, %v621_v6 }
 0x124   :  { %v821_v58 = vsel %vm819_vm15, %v820_v51, %v818_v54  ;;  %v704_v61 = vsub.f32 %v656_v50, %v688_v57  ;;  %v362_v47 = vadd.f32 %v361_v39, %v1479_v55 }
 0x125   :  { %925 = vst [vmem:[#allocation7 + $0x38] sm:$0xff] %v821_v58  ;;  %v826_v59 = vsub.f32 1.5, %v825_v56 }
 0x126   :  { %v1162_v62 = vpop.eup %1161  ;;  %v1482_v4 = vmax.f32 %v704_v61, 0.0 }
 0x127   :  { %v466_v60 = vpop.f32.mrf.mxu2  ;;  %v827_v0 = vmul.f32 %v1160_v40, %v826_v59  ;;  %v835_v2 = vmul.f32 %v1162_v62, %v1469_v41 }
 0x128   :  { %v490_v63 = vadd.f32 %v466_v60, %v354_v52  ;;  %1163 = vrsqrt.f32 %v1482_v4  ;;  %vm853_vm4 = vcmp.eq.f32.partialorder %v1482_v4, inf  ;;  %v856_v50 = vand.u32 2147483648, %v1482_v4 }
 0x129   :  { %v356_v5 = vpop.f32.mrf.mxu1  ;;  %v828_v7 = vmul.f32 %v827_v0, %v1457_v21  ;;  %v836_v8 = vmul.f32 %v1162_v62, %v835_v2  ;;  %vm855_vm5 = vcmp.eq.f32.partialorder %v1482_v4, 0.0  ;;  %v363_v0 = vpop.f32.mrf.mxu3 }
 0x12a   :  { %v689_v10 = vmul.f32 2.0, %v490_v63  ;;  %v357_v14 = vadd.f32 %v356_v5, %v1447_v3  ;;  %v844_v3 = vand.u32 2147483648, %v1469_v41  ;;  %v636_v63 = vpop.permute.xlu2 %635 }
 0x12b   :  { %v830_v11 = vsel %vm829_vm0, %v1457_v21, %v828_v7  ;;  %v837_v12 = vmul.f32 0.5, %v836_v8  ;;  %v626_v21 = vpop.permute.xlu0 %625  ;;  %v364_v8 = vadd.f32 %v363_v0, %v1492_v17 }
 0x12c   :  { %v833_v13 = vsel %vm831_vm1, %v832_v9, %v830_v11  ;;  %v705_v15 = vsub.f32 %v657_v1, %v689_v10  ;;  %v658_v24 = vadd.f32 %v1401_v53, %v626_v21 }
 0x12d   :  { %926 = vst [vmem:[#allocation7 + $0x40] sm:$0xff] %v833_v13  ;;  %v838_v16 = vsub.f32 1.5, %v837_v12 }
 0x12e   :  { %v1494_v19 = vmax.f32 %v705_v15, 0.0  ;;  %v1164_v22 = vpop.eup %1163 }
 0x12f   :  { %v469_v18 = vpop.f32.mrf.mxu2  ;;  %v839_v23 = vmul.f32 %v1162_v62, %v838_v16  ;;  %v847_v26 = vmul.f32 %v1164_v22, %v1482_v4 }
 0x130   :  { %v491_v20 = vadd.f32 %v469_v18, %v357_v14  ;;  %1165 = vrsqrt.f32 %v1494_v19  ;;  %vm865_vm6 = vcmp.eq.f32.partialorder %v1494_v19, inf  ;;  %v868_v2 = vand.u32 2147483648, %v1494_v19 }
 0x131   :  { %v840_v25 = vmul.f32 %v839_v23, %v1469_v41  ;;  %v358_v28 = vpop.f32.mrf.mxu1  ;;  %v848_v30 = vmul.f32 %v1164_v22, %v847_v26  ;;  %vm867_vm7 = vcmp.eq.f32.partialorder %v1494_v19, 0.0 }
 0x132   :  { %v690_v31 = vmul.f32 2.0, %v491_v20  ;;  %v359_v33 = vadd.f32 %v358_v28, %v1463_v27 }
 0x133   :  { %v842_v29 = vsel %vm841_vm2, %v1469_v41, %v840_v25  ;;  %v849_v34 = vmul.f32 0.5, %v848_v30  ;;  %v659_v41 = vadd.f32 %v1401_v53, %v631_v45  ;;  %v641_v15 = vpop.permute.xlu0 %640 }
 0x134   :  { %v845_v32 = vsel %vm843_vm3, %v844_v3, %v842_v29  ;;  %v706_v35 = vsub.f32 %v658_v24, %v690_v31 }
 0x135   :  { %927 = vst [vmem:[#allocation7 + $0x48] sm:$0xff] %v845_v32  ;;  %v850_v42 = vsub.f32 1.5, %v849_v34 }
 0x136   :  { %v1166_v37 = vpop.eup %1165  ;;  %v722_v43 = vmax.f32 %v706_v35, 0.0 }
 0x137   :  { %v471_v36 = vpop.f32.mrf.mxu2  ;;  %v859_v40 = vmul.f32 %v1166_v37, %v1494_v19  ;;  %v851_v48 = vmul.f32 %v1164_v22, %v850_v42 }
 0x138   :  { %v492_v38 = vadd.f32 %v471_v36, %v359_v33  ;;  %1167 = vrsqrt.f32 %v722_v43  ;;  %vm877_vm8 = vcmp.eq.f32.partialorder %v722_v43, inf  ;;  %v880_v21 = vand.u32 2147483648, %v722_v43 }
 0x139   :  { %v860_v46 = vmul.f32 %v1166_v37, %v859_v40  ;;  %v852_v27 = vmul.f32 %v851_v48, %v1482_v4  ;;  %vm879_vm9 = vcmp.eq.f32.partialorder %v722_v43, 0.0 }
 0x13a   :  { %v691_v49 = vmul.f32 2.0, %v492_v38 }
 0x13b   :  { %v861_v44 = vmul.f32 0.5, %v860_v46  ;;  %v854_v54 = vsel %vm853_vm4, %v1482_v4, %v852_v27  ;;  %v660_v4 = vadd.f32 %v1401_v53, %v636_v63 }
 0x13c   :  { %v707_v51 = vsub.f32 %v659_v41, %v691_v49  ;;  %v857_v57 = vsel %vm855_vm5, %v856_v50, %v854_v54 }
 0x13d   :  { %v862_v52 = vsub.f32 1.5, %v861_v44  ;;  %928 = vst [vmem:[#allocation7 + $0x50] sm:$0xff] %v857_v57 }
 0x13e   :  { %v723_v58 = vmax.f32 %v707_v51, 0.0  ;;  %v1168_v60 = vpop.eup %1167 }
 0x13f   :  { %v474_v56 = vpop.f32.mrf.mxu2  ;;  %v863_v61 = vmul.f32 %v1166_v37, %v862_v52  ;;  %v871_v62 = vmul.f32 %v1168_v60, %v722_v43 }
 0x140   :  { %v493_v59 = vadd.f32 %v474_v56, %v362_v47  ;;  %1169 = vrsqrt.f32 %v723_v58  ;;  %vm889_vm10 = vcmp.eq.f32.partialorder %v723_v58, inf  ;;  %v892_v34 = vand.u32 2147483648, %v723_v58 }
 0x141   :  { %v864_v55 = vmul.f32 %v863_v61, %v1494_v19  ;;  %v872_v5 = vmul.f32 %v1168_v60, %v871_v62  ;;  %vm891_vm11 = vcmp.eq.f32.partialorder %v723_v58, 0.0 }
 0x142   :  { %v692_v1 = vmul.f32 2.0, %v493_v59 }
 0x143   :  { %v866_v6 = vsel %vm865_vm6, %v1494_v19, %v864_v55  ;;  %v873_v9 = vmul.f32 0.5, %v872_v5  ;;  %v661_v19 = vadd.f32 %v1401_v53, %v641_v15 }
 0x144   :  { %v869_v7 = vsel %vm867_vm7, %v868_v2, %v866_v6  ;;  %v708_v10 = vsub.f32 %v660_v4, %v692_v1 }
 0x145   :  { %929 = vst [vmem:[#allocation7 + $0x58] sm:$0xff] %v869_v7  ;;  %v874_v13 = vsub.f32 1.5, %v873_v9 }
 0x146   :  { %v1170_v12 = vpop.eup %1169  ;;  %v724_v18 = vmax.f32 %v708_v10, 0.0 }
 0x147   :  { %v476_v11 = vpop.f32.mrf.mxu2  ;;  %v883_v16 = vmul.f32 %v1170_v12, %v723_v58  ;;  %v875_v20 = vmul.f32 %v1168_v60, %v874_v13 }
 0x148   :  { %v494_v14 = vadd.f32 %v476_v11, %v364_v8  ;;  %1171 = vrsqrt.f32 %v724_v18  ;;  %vm901_vm12 = vcmp.eq.f32.partialorder %v724_v18, inf  ;;  %v904_v46 = vand.u32 2147483648, %v724_v18 }
 0x149   :  { %v884_v22 = vmul.f32 %v1170_v12, %v883_v16  ;;  %v876_v23 = vmul.f32 %v875_v20, %v722_v43  ;;  %vm903_vm13 = vcmp.eq.f32.partialorder %v724_v18, 0.0 }
 0x14a   :  { %v693_v25 = vmul.f32 2.0, %v494_v14 }
 0x14b   :  { %v885_v17 = vmul.f32 0.5, %v884_v22  ;;  %v878_v26 = vsel %vm877_vm8, %v722_v43, %v876_v23 }
 0x14c   :  { %v709_v28 = vsub.f32 %v661_v19, %v693_v25  ;;  %v881_v3 = vsel %vm879_vm9, %v880_v21, %v878_v26 }
 0x14d   :  { %v886_v24 = vsub.f32 1.5, %v885_v17  ;;  %930 = vst [vmem:[#allocation7 + $0x60] sm:$0xff] %v881_v3 }
 0x14e   :  { %v725_v29 = vmax.f32 %v709_v28, 0.0  ;;  %v1172_v30 = vpop.eup %1171 }
 0x14f   :  { %v887_v31 = vmul.f32 %v1170_v12, %v886_v24  ;;  %v895_v32 = vmul.f32 %v1172_v30, %v724_v18 }
 0x150   :  { %1173 = vrsqrt.f32 %v725_v29  ;;  %vm913_vm14 = vcmp.eq.f32.partialorder %v725_v29, inf  ;;  %v916_v50 = vand.u32 2147483648, %v725_v29  ;;  %vm915_vm15 = vcmp.eq.f32.partialorder %v725_v29, 0.0 }
 0x151   :  { %v888_v33 = vmul.f32 %v887_v31, %v723_v58  ;;  %v896_v53 = vmul.f32 %v1172_v30, %v895_v32 }
 0x153   :  { %v890_v35 = vsel %vm889_vm10, %v723_v58, %v888_v33  ;;  %v897_v37 = vmul.f32 0.5, %v896_v53 }
 0x154   :  { %v893_v36 = vsel %vm891_vm11, %v892_v34, %v890_v35 }
 0x155   :  { %931 = vst [vmem:[#allocation7 + $0x68] sm:$0xff] %v893_v36  ;;  %v898_v39 = vsub.f32 1.5, %v897_v37 }
 0x156   :  { %v1174_v38 = vpop.eup %1173 }
 0x157   :  { %v907_v40 = vmul.f32 %v1174_v38, %v725_v29  ;;  %v899_v42 = vmul.f32 %v1172_v30, %v898_v39 }
 0x159   :  { %v908_v43 = vmul.f32 %v1174_v38, %v907_v40  ;;  %v900_v45 = vmul.f32 %v899_v42, %v724_v18 }
 0x15b   :  { %v909_v48 = vmul.f32 0.5, %v908_v43  ;;  %v902_v41 = vsel %vm901_vm12, %v724_v18, %v900_v45 }
 0x15c   :  { %v905_v49 = vsel %vm903_vm13, %v904_v46, %v902_v41 }
 0x15d   :  { %v910_v44 = vsub.f32 1.5, %v909_v48  ;;  %932 = vst [vmem:[#allocation7 + $0x70] sm:$0xff] %v905_v49 }
 0x15f   :  { %v911_v27 = vmul.f32 %v1174_v38, %v910_v44 }
 0x161   :  { %v912_v47 = vmul.f32 %v911_v27, %v725_v29 }
 0x163   :  { %v914_v51 = vsel %vm913_vm14, %v725_v29, %v912_v47 }
 0x164   :  { %v917_v52 = vsel %vm915_vm15, %v916_v50, %v914_v51 }
 0x165   :  { %933 = vst [vmem:[#allocation7 + $0x78] sm:$0xff] %v917_v52 }
 0x166   :  { %946 = dma.vmem_to_hbm [thread:$0]  %s939_s4, 2048, %s941_s21, [#allocation4], %s1259_s22, %s1259_s22, %s1260_s23  }
 0x167   :  { %1251 = dma.done.wait [#allocation4], 2048  }
 0x168   :  { %1252 = vsyncadd [#allocation4], 4294965248 }
 0x169   :  { %951 = vsyncpa [#allocation3], 1 }
 0x16a   :  { %952 = vsyncpa [#allocation6], 1 }
 0x16b   :  { %953 = vsyncpa [#allocation4], 1 }

</bundles_post_ra>
